<compile_context>
chip_gen: v7x
topology: tpu7x:2x2x1
jax: 0.10.0
libtpu: 0.0.40
codegen_flags: <defaults>
</compile_context>

<pallas_src>
from functools import partial

import numpy as np
import jax
import jax.numpy as jnp
from jax import lax
from jax.experimental import pallas as pl
from jax.experimental.pallas import tpu as pltpu


def _round_up(x, m):
    return ((x + m - 1) // m) * m


def _divisor_tile(padded, cap, align):
    """Largest multiple of `align` that divides `padded` and is <= cap."""
    best = align
    t = align
    limit = min(cap, padded)
    while t <= limit:
        if padded % t == 0:
            best = t
        t += align
    return best


# --------------------------------------------------------------------------
# Pallas kernel: tiled matmul (bf16 in, f32 accumulate in o_ref) with fused
# bias + ReLU + LocalResponseNorm(size=1) epilogue.
# --------------------------------------------------------------------------
def _mm_kernel(x_ref, w_ref, b_ref, o_ref, *, relu, lrn):
    k = pl.program_id(2)

    @pl.when(k == 0)
    def _():
        o_ref[...] = jnp.zeros_like(o_ref)

    o_ref[...] += jnp.dot(x_ref[...], w_ref[...],
                          preferred_element_type=jnp.float32)

    @pl.when(k == pl.num_programs(2) - 1)
    def _():
        y = o_ref[...] + b_ref[...]
        if relu:
            y = jnp.maximum(y, 0.0)
        if lrn:
            # nn.LocalResponseNorm(size=1): y / (1 + (1e-4/1) * y^2)^0.75
            # a^-0.75 = rsqrt(a) * rsqrt(sqrt(a))  (EUP ops, no pow/divide)
            a = 1.0 + 1e-4 * y * y
            y = y * (lax.rsqrt(a) * lax.rsqrt(jnp.sqrt(a)))
        o_ref[...] = y


def matmul_bias_act(x, w, b, *, relu=False, lrn=False,
                    tm_cap=256, tn_cap=1024, tk_cap=2048):
    """out = act(x @ w + b).

    w must be pre-padded to (Kp, Np) with Kp, Np multiples of 128 (extra rows/
    cols zero) and is expected in bf16.  b has length Np (f32).  Returns an
    f32 array of shape (M, Np).
    """
    M, K = x.shape
    Kp, Np = w.shape
    assert Kp % 128 == 0 and Np % 128 == 0 and K <= Kp
    assert b.shape[0] == Np

    tk = _divisor_tile(Kp, tk_cap, 128)
    tn = _divisor_tile(Np, tn_cap, 128)
    Mp = _round_up(M, 8)
    tm = _divisor_tile(Mp, tm_cap, 8)

    xb = x.astype(jnp.bfloat16)
    if (Mp, Kp) != (M, K):
        xb = jnp.zeros((Mp, Kp), jnp.bfloat16).at[:M, :K].set(xb)
    wb = w if w.dtype == jnp.bfloat16 else w.astype(jnp.bfloat16)
    bp = b.reshape(1, Np).astype(jnp.float32)

    grid = (Mp // tm, Np // tn, Kp // tk)
    out = pl.pallas_call(
        partial(_mm_kernel, relu=relu, lrn=lrn),
        out_shape=jax.ShapeDtypeStruct((Mp, Np), jnp.float32),
        grid_spec=pltpu.PrefetchScalarGridSpec(
            num_scalar_prefetch=0,
            grid=grid,
            in_specs=[
                pl.BlockSpec((tm, tk), lambda i, j, k: (i, k)),
                pl.BlockSpec((tk, tn), lambda i, j, k: (k, j)),
                pl.BlockSpec((1, tn), lambda i, j, k: (0, j)),
            ],
            out_specs=pl.BlockSpec((tm, tn), lambda i, j, k: (i, j)),
        ),
        compiler_params=pltpu.CompilerParams(
            dimension_semantics=("parallel", "parallel", "arbitrary"),
            vmem_limit_bytes=32 * 1024 * 1024),
    )(xb, wb, bp)
    if Mp != M:
        out = out[:M]
    return out


# --------------------------------------------------------------------------
# Pallas kernel: max reduction over stacked pooling windows (row-tiled grid)
# --------------------------------------------------------------------------
def _max_reduce_kernel(x_ref, o_ref):
    o_ref[...] = jnp.max(x_ref[...], axis=0)


def maxpool2d(x, k=3, s=2, tr_cap=512):
    """MaxPool2d(kernel_size=3, stride=2) on NHWC input (C multiple of 128)."""
    N, H, W, C = x.shape
    assert C % 128 == 0
    OH = (H - k) // s + 1
    OW = (W - k) // s + 1
    wins = [x[:, di:di + s * OH:s, dj:dj + s * OW:s, :]
            for di in range(k) for dj in range(k)]
    M = N * OH * OW
    stacked = jnp.stack(wins, axis=0).reshape(k * k, M, C)

    Mp8 = _round_up(M, 8)
    tr = min(tr_cap, Mp8)
    Mp = _round_up(Mp8, tr)
    if Mp != M:
        stacked = jnp.zeros((k * k, Mp, C), jnp.float32).at[:, :M, :].set(stacked)

    out = pl.pallas_call(
        _max_reduce_kernel,
        out_shape=jax.ShapeDtypeStruct((Mp, C), jnp.float32),
        grid_spec=pltpu.PrefetchScalarGridSpec(
            num_scalar_prefetch=0,
            grid=(Mp // tr,),
            in_specs=[pl.BlockSpec((k * k, tr, C), lambda i: (0, i, 0))],
            out_specs=pl.BlockSpec((tr, C), lambda i: (i, 0)),
        ),
        compiler_params=pltpu.CompilerParams(
            dimension_semantics=("parallel",)),
    )(stacked)
    if Mp != M:
        out = out[:M]
    return out.reshape(N, OH, OW, C)


# --------------------------------------------------------------------------
# Convolution = im2col (glue) + Pallas matmul
# --------------------------------------------------------------------------
def _im2col(x, k, s, p):
    N, H, W, C = x.shape
    if p:
        x = jnp.pad(x, ((0, 0), (p, p), (p, p), (0, 0)))
    H2, W2 = H + 2 * p, W + 2 * p
    OH = (H2 - k) // s + 1
    OW = (W2 - k) // s + 1
    cols = [x[:, di:di + s * OH:s, dj:dj + s * OW:s, :]
            for di in range(k) for dj in range(k)]
    patches = jnp.stack(cols, axis=3)               # (N, OH, OW, k*k, C)
    return patches.reshape(N * OH * OW, k * k * C), OH, OW


def conv2d(x, w, b, *, k, s=1, p=0, relu=False, lrn=False):
    """x: NHWC f32, w: (Kp, Cout_pad) bf16 HWIO-flattened (pre-padded)."""
    N = x.shape[0]
    patches, OH, OW = _im2col(x, k, s, p)
    out = matmul_bias_act(patches, w, b, relu=relu, lrn=lrn)
    return out.reshape(N, OH, OW, -1)


# --------------------------------------------------------------------------
# Bilinear resize to 128x128 (F.interpolate, mode='bilinear',
# align_corners=False) — one fused Pallas kernel: Ah @ x @ Aw^T per image.
# --------------------------------------------------------------------------
def _bilinear_matrix(in_size, out_size):
    A = np.zeros((out_size, in_size), np.float32)
    scale = in_size / out_size
    for j in range(out_size):
        src = (j + 0.5) * scale - 0.5
        src = max(src, 0.0)
        i0 = min(int(np.floor(src)), in_size - 1)
        i1 = min(i0 + 1, in_size - 1)
        w = src - i0
        A[j, i0] += 1.0 - w
        A[j, i1] += w
    return A


def _resize_kernel(ah_ref, awt_ref, x_ref, o_ref):
    t = jnp.dot(ah_ref[...], x_ref[0], preferred_element_type=jnp.float32)
    o_ref[0] = jnp.dot(t, awt_ref[...], preferred_element_type=jnp.float32)


def bilinear_resize_128(x):
    """x: (N, H, W) f32 with H, W <= 128 -> (N, 128, 128) f32."""
    N, H, W = x.shape
    assert H <= 128 and W <= 128
    Ah = _bilinear_matrix(H, 128)                   # (128, H)
    Aw = _bilinear_matrix(W, 128)                   # (128, W)
    # Pad the tiny contraction dims up to 128 (zeros) so the in-kernel dots
    # are plain 128x128 matmuls; padding contributes exact zeros.
    Ahp = jnp.zeros((128, 128), jnp.float32).at[:, :H].set(jnp.asarray(Ah))
    Awtp = jnp.zeros((128, 128), jnp.float32).at[:W, :].set(jnp.asarray(Aw).T)
    xp = jnp.zeros((N, 128, 128), jnp.float32).at[:, :H, :W].set(x)

    return pl.pallas_call(
        _resize_kernel,
        out_shape=jax.ShapeDtypeStruct((N, 128, 128), jnp.float32),
        grid_spec=pltpu.PrefetchScalarGridSpec(
            num_scalar_prefetch=0,
            grid=(N,),
            in_specs=[
                pl.BlockSpec((128, 128), lambda n: (0, 0)),
                pl.BlockSpec((128, 128), lambda n: (0, 0)),
                pl.BlockSpec((1, 128, 128), lambda n: (n, 0, 0)),
            ],
            out_specs=pl.BlockSpec((1, 128, 128), lambda n: (n, 0, 0)),
        ),
        compiler_params=pltpu.CompilerParams(
            dimension_semantics=("parallel",)),
    )(Ahp, Awtp, xp)


# --------------------------------------------------------------------------
# Parameters (deterministic synthetic init; shapes from AlexNet.__init__).
# Weights are pre-padded to 128-aligned K/N (zero padding) and stored in bf16
# ONCE here, so the forward pass never re-pads / re-casts large weights.
# --------------------------------------------------------------------------
def init_params(key):
    ks = jax.random.split(key, 8)

    def conv_w(k_, kk, cin, cout, cin_pad=None, cout_pad=None):
        cin_pad = cin if cin_pad is None else cin_pad
        cout_pad = cout if cout_pad is None else cout_pad
        fan = kk * kk * cin
        w = jax.random.normal(k_, (kk, kk, cin, cout), jnp.float32) / np.sqrt(fan)
        wp = jnp.zeros((kk, kk, cin_pad, cout_pad), jnp.float32)
        wp = wp.at[:, :, :cin, :cout].set(w)
        wp = wp.reshape(kk * kk * cin_pad, cout_pad)
        Kp = _round_up(wp.shape[0], 128)
        if Kp != wp.shape[0]:
            wp = jnp.zeros((Kp, cout_pad), jnp.float32).at[:wp.shape[0]].set(wp)
        return wp.astype(jnp.bfloat16)

    def fc_w(k_, cin, cout, cout_pad=None):
        cout_pad = cout if cout_pad is None else cout_pad
        w = jax.random.normal(k_, (cin, cout), jnp.float32) / np.sqrt(cin)
        if cout_pad != cout:
            w = jnp.zeros((cin, cout_pad), jnp.float32).at[:, :cout].set(w)
        return w.astype(jnp.bfloat16)

    z = lambda n: jnp.zeros((n,), jnp.float32)

    p = {
        # conv1: 96 output channels padded to 128 (zero lanes) for lane density
        'c1w': conv_w(ks[0], 11, 1, 96, cout_pad=128),   'c1b': z(128),
        # conv2 consumes the padded 128-channel slab (extra input rows zero)
        'c2w': conv_w(ks[1], 5, 96, 256, cin_pad=128),   'c2b': z(256),
        'c3w': conv_w(ks[2], 3, 256, 384),               'c3b': z(384),
        'c4w': conv_w(ks[3], 3, 384, 384),               'c4b': z(384),
        'c5w': conv_w(ks[4], 3, 384, 256),               'c5b': z(256),
        'f1w': fc_w(ks[5], 1024, 4096),                  'f1b': z(4096),
        'f2w': fc_w(ks[6], 4096, 4096),                  'f2b': z(4096),
        # final classifier padded 10 -> 128 outputs (sliced after the matmul)
        'f3w': fc_w(ks[7], 4096, 10, cout_pad=128),      'f3b': z(128),
    }
    return p


# --------------------------------------------------------------------------
# Full forward pass
# --------------------------------------------------------------------------
def alexnet_forward(params, x_nchw):
    N, C, H, W = x_nchw.shape
    assert C == 1

    # F.interpolate(x, size=128, mode='bilinear', align_corners=False)
    x = bilinear_resize_128(x_nchw[:, 0, :, :].astype(jnp.float32))
    x = x[..., None]                                                # (N,128,128,1)

    # features
    x = conv2d(x, params['c1w'], params['c1b'], k=11, s=4, p=0,
               relu=True, lrn=True)                                 # (N,30,30,128)
    x = maxpool2d(x)                                                # (N,14,14,128)
    x = conv2d(x, params['c2w'], params['c2b'], k=5, s=1, p=2,
               relu=True, lrn=True)                                 # (N,14,14,256)
    x = maxpool2d(x)                                                # (N,6,6,256)
    x = conv2d(x, params['c3w'], params['c3b'], k=3, s=1, p=1, relu=True)
    x = conv2d(x, params['c4w'], params['c4b'], k=3, s=1, p=1, relu=True)
    x = conv2d(x, params['c5w'], params['c5b'], k=3, s=1, p=1, relu=True)
    x = maxpool2d(x)                                                # (N,2,2,256)

    # x.view(N, -1) with PyTorch's (C, H, W) flatten order
    x = jnp.transpose(x, (0, 3, 1, 2)).reshape(N, -1)               # (N, 1024)

    # classifier
    x = matmul_bias_act(x, params['f1w'], params['f1b'], relu=True)
    # TODO(synk): nn.Dropout is treated as inference-mode identity (no RNG mask).
    x = matmul_bias_act(x, params['f2w'], params['f2b'], relu=True)
    x = matmul_bias_act(x, params['f3w'], params['f3b'])            # (N, 128)
    return x[:, :10]


if __name__ == "__main__":
    x = jax.random.normal(jax.random.PRNGKey(0), (2, 1, 16, 16), jnp.float32)
    params = init_params(jax.random.PRNGKey(1))
    out = alexnet_forward(params, x)
    out = jax.block_until_ready(out)
    assert out.shape == (2, 10), out.shape
    assert bool(jnp.all(jnp.isfinite(out)))
    print("KERNEL_OK")
</pallas_src>

<mosaic_0001>
module attributes {stable_mosaic.version = 11 : i64} {
  func.func @_resize_kernel(%arg0: i32, %arg1: memref<128x128xf32, #tpu.memory_space<vmem>>, %arg2: memref<128x128xf32, #tpu.memory_space<vmem>>, %arg3: memref<1x128x128xf32, #tpu.memory_space<vmem>>, %arg4: memref<1x128x128xf32, #tpu.memory_space<vmem>>) attributes {dimension_semantics = [#tpu.dimension_semantics<parallel>], iteration_bounds = array<i64: 2>, scalar_prefetch = 0 : i64, scratch_operands = 0 : i64, tpu.core_type = #tpu.core_type<tc>, window_params = [{pipeline_mode = #tpu.pipeline_mode<synchronous>, transform_indices = @transform_0, window_bounds = array<i64: 128, 128>}, {pipeline_mode = #tpu.pipeline_mode<synchronous>, transform_indices = @transform_1, window_bounds = array<i64: 128, 128>}, {transform_indices = @transform_2, window_bounds = array<i64: 1, 128, 128>}, {transform_indices = @transform_3, window_bounds = array<i64: 1, 128, 128>}]} {
    %c0 = arith.constant 0 : index
    %c0_0 = arith.constant 0 : index
    %0 = vector.load %arg1[%c0, %c0_0] : memref<128x128xf32, #tpu.memory_space<vmem>>, vector<128x128xf32>
    %c0_1 = arith.constant 0 : index
    %c0_2 = arith.constant 0 : index
    %c0_3 = arith.constant 0 : index
    %1 = vector.load %arg3[%c0_1, %c0_2, %c0_3] : memref<1x128x128xf32, #tpu.memory_space<vmem>>, vector<1x128x128xf32>
    %2 = vector.shape_cast %1 : vector<1x128x128xf32> to vector<128x128xf32>
    %cst = arith.constant dense<0.000000e+00> : vector<128x128xf32>
    %3 = tpu.matmul %0, %2, %cst {dimension_numbers = #tpu.dot_dimension_numbers<[1], [0], [0], [1], [0, 0, 1, 1], [], []>} : vector<128x128xf32>, vector<128x128xf32>, vector<128x128xf32> -> vector<128x128xf32>
    %c0_4 = arith.constant 0 : index
    %c0_5 = arith.constant 0 : index
    %4 = vector.load %arg2[%c0_4, %c0_5] : memref<128x128xf32, #tpu.memory_space<vmem>>, vector<128x128xf32>
    %cst_6 = arith.constant dense<0.000000e+00> : vector<128x128xf32>
    %5 = tpu.matmul %3, %4, %cst_6 {dimension_numbers = #tpu.dot_dimension_numbers<[1], [0], [0], [1], [0, 0, 1, 1], [], []>} : vector<128x128xf32>, vector<128x128xf32>, vector<128x128xf32> -> vector<128x128xf32>
    %c0_7 = arith.constant 0 : index
    %c0_8 = arith.constant 0 : index
    %c0_9 = arith.constant 0 : index
    %6 = vector.load %arg4[%c0_7, %c0_8, %c0_9] : memref<1x128x128xf32, #tpu.memory_space<vmem>>, vector<1x128x128xf32>
    %7 = vector.shape_cast %6 : vector<1x128x128xf32> to vector<128x128xf32>
    %8 = vector.shape_cast %5 : vector<128x128xf32> to vector<1x128x128xf32>
    tpu.vector_store %arg4[%c0_7, %c0_8, %c0_9], %8 {strides = array<i32>} : memref<1x128x128xf32, #tpu.memory_space<vmem>>, vector<1x128x128xf32>,
    return
  }
  func.func @transform_0(%arg0: i32) -> (i32, i32) {
    %c0_i32 = arith.constant 0 : i32
    %c0_i32_0 = arith.constant 0 : i32
    %c0_i32_1 = arith.constant 0 : i32
    return %c0_i32, %c0_i32_0 : i32, i32
  }
  func.func @transform_1(%arg0: i32) -> (i32, i32) {
    %c0_i32 = arith.constant 0 : i32
    %c0_i32_0 = arith.constant 0 : i32
    %c0_i32_1 = arith.constant 0 : i32
    return %c0_i32, %c0_i32_0 : i32, i32
  }
  func.func @transform_2(%arg0: i32) -> (i32, i32, i32) {
    %c0_i32 = arith.constant 0 : i32
    %c0_i32_0 = arith.constant 0 : i32
    %c0_i32_1 = arith.constant 0 : i32
    return %arg0, %c0_i32, %c0_i32_0 : i32, i32, i32
  }
  func.func @transform_3(%arg0: i32) -> (i32, i32, i32) {
    %c0_i32 = arith.constant 0 : i32
    %c0_i32_0 = arith.constant 0 : i32
    %c0_i32_1 = arith.constant 0 : i32
    return %arg0, %c0_i32, %c0_i32_0 : i32, i32, i32
  }
}

</mosaic_0001>

<bundles_post_ra>
// kernel: tpu_custom_call.1
= control target key start
LH: loop header
LB: loop body
LE: loop exit
PB: predicated region body
PF: predicated region fallthrough
CT: control target
= control target key end

     0   :  { %8 = vsyncpa [#allocation3], 0  ;;  %s1479_s0 = inlined_call_operand.hbm [shape: f32[128,128], index: 0, kind: input, shape index: {}]   ;;  %s1480_s1 = inlined_call_operand.hbm [shape: f32[128,128], index: 1, kind: input, shape index: {}]   ;;  %s1481_s2 = inlined_call_operand.hbm [shape: f32[2,128,128], index: 2, kind: input, shape index: {}]   ;;  %s1482_s3 = inlined_call_operand.hbm [shape: f32[2,128,128], index: 3, kind: output, shape index: {}]  }
   0x1   :  { %9 = vsyncpa [#allocation6], 0 }
   0x2   :  { %10 = vsyncpa [#allocation4], 0 }
   0x3   :  { %12 = vsyncpa [#allocation4 + $0x1], 0  ;;  %s1197_s12 = smov 0   ;;  %s1199_s13 = smov 0  }
   0x4   :  { %s1201_s14 = smov 0   ;;  %s1203_s15 = smov 0  }
   0x5 LB: > { %s1218_s16 = sadd.s32 4294967295, %s1167_s15   ;;  %s676_s17 = sadd.s32 4294967294, %s1167_s15   ;;  %s1167_s15 = sphi %s1203_s15, %s1510_s15   ;;  %s1163_s14 = sphi %s1201_s14, %s1509_s14   ;;  %s1159_s13 = sphi %s1199_s13, %s1508_s13   ;;  %s1155_s12 = sphi %s1197_s12, %s1507_s12  }
   0x6   : > { %s1222_s18 = sadd.s32 1, %s1167_s15   ;;  %s67_s19 = sadd.s32 1, %s1163_s14 }
   0x7   : > { %s64_s20 = ssub.s32 %s1167_s15, %s1222_s18  ;;  %p74_p0 = scmp.ne.s32.totalorder %s1163_s14, %s1159_s13 }
   0x8   : > { %p65_p1 = scmp.eq.s32.totalorder %s64_s20, 0  ;;  %p75_p2 = scmp.eq.s32.totalorder %s1167_s15, 0 }
   0x9   : > { %p80_p3 = scmp.ne.s32.totalorder %s1159_s13, %s1155_s12  ;;  %p1483_p4 = scmp.eq.s32.totalorder %s1218_s16, 0 }
   0xa   : > { %s1234_s21 = scalar_select %p65_p1, %s1163_s14, %s67_s19  }
   0xb   : > { %p1236_p5 = por %p75_p2, %p74_p0  ;;  %p1242_p6 = por %p1483_p4, %p80_p3 }
   0xc   : > { %p104_p7 = scmp.eq.s32.totalorder %s1218_s16, 1  ;;  %p110_p8 = scmp.eq.s32.totalorder %s676_s17, 1 }
   0xd   : > { %s1488_s22 = scalar_select %p1236_p5, 1, 0 }
   0xe   : > { %s1489_s23 = scalar_select %p1242_p6, 1, 0 }
   0xf   : > { %p677_p9 = scmp.ge.s32.totalorder %s1167_s15, 1  ;;  %p117_p10 = scmp.lt.s32.totalorder %s1167_s15, 3 }
  0x10   : > { %p1249_p11 = por %p104_p7, %p74_p0  ;;  %p1253_p12 = por %p110_p8, %p80_p3 }
  0x11   : > { %p1257_p13 = pnand %p677_p9, %p117_p10  ;;  %s1169_s27 = smov [#allocation2]  }
  0x12   : > { %s1490_s24 = scalar_select %p1249_p11, 1, 0 }
  0x13   : > { %s1491_s25 = scalar_select %p1253_p12, 1, 0 }
  0x14   : > { %s1492_s26 = scalar_select %p1257_p13, 1, 0 }
  0x15   : > { %p948_p1 = pneg %p1257_p13  ;;  %s129_s28 = sshll.u32 %s1169_s27, 4  ;;  %s130_s28 = int_to_ptr.vmem [resolvable:$true] %s129_s28 }
  0x16   : > { %s1170_s30 = smov [#allocation5]   ;;  %s1007_s7 = scalar_lea.hbm %s1479_s0, 2048 }
  0x17   : > { %p1265_p2 = pnand %p948_p1, %p1483_p4  ;;  %s142_s4 = sshll.u32 %s1170_s30, 4  ;;  %s143_s4 = int_to_ptr.vmem [resolvable:$true] %s142_s4 }
  0x18   : > { %p1008_p7 = scmp.ne.s32.totalorder %s1479_s0, %s1007_s7  ;;  %p1014_p1 = scmp.lt.u32.totalorder %s1007_s7, %s1479_s0 }
  0x19   : > { %p1009_p8 = pneg %p1265_p2 }
  0x1b   : > { %p1010_p9 = pnand %p1009_p8, %p1008_p7 }
  0x1d   : > { %p1011_p10 = pneg %p1010_p9 }
  0x1f   : > { %p1016_p0 = pnand %p1014_p1, %p1011_p10 }
  0x21   : > { %1019 = shalt.err (!%p1016_p0)
}
  0x22   : > { %s1020_s17 = scalar_lea.vmem %s130_s28, 2048  ;;  %p1028_p11 = scmp.lt.s32.totalorder %s130_s28, %s130_s28 }
  0x23   : > { %p1021_p4 = scmp.ne.s32.totalorder %s130_s28, %s1020_s17  ;;  %p1029_p6 = scmp.lt.s32.totalorder %s1020_s17, %s1020_s17 }
  0x25   : > { %p1023_p3 = pnand %p1021_p4, %p1009_p8  ;;  %p1030_p13 = por %p1029_p6, %p1028_p11 }
  0x27   : > { %p1024_p12 = pneg %p1023_p3 }
  0x29   : > { %p1031_p5 = pnand %p1030_p13, %p1024_p12 }
  0x2b   : > { %1034 = shalt.err (!%p1031_p5)
}
  0x2c   : > { %s1171_s19 = smov 128   ;;  %s1172_s20 = smov 8  }
  0x2d   : > { %951 = dma.hbm_to_vmem [thread:$0]  (!%p1265_p2), %s1479_s0, 2048, %s130_s28, [#allocation3], %s1171_s19, %s1171_s19, %s1172_s20  }
  0x2e   : > { %p1494_p4 = scmp.ne.s32.totalorder %s1488_s22, 0  ;;  %p1495_p0 = scmp.lt.s32.totalorder %s1167_s15, 2 }
  0x2f   : > { %s1035_s8 = scalar_lea.hbm %s1480_s1, 2048 }
  0x30   : > { %p1300_p3 = pnand %p1495_p0, %p1494_p4  ;;  %p1036_p5 = scmp.ne.s32.totalorder %s1480_s1, %s1035_s8 }
  0x31   : > { %p1042_p12 = scmp.lt.u32.totalorder %s1035_s8, %s1480_s1 }
  0x32   : > { %s1496_s5 = scalar_select %p1300_p3, 1, 0 }
  0x33   : > { %p1038_p6 = pnand %p1036_p5, %p1009_p8 }
  0x35   : > { %p1039_p11 = pneg %p1038_p6 }
  0x37   : > { %p1044_p13 = pnand %p1042_p12, %p1039_p11 }
  0x39   : > { %1047 = shalt.err (!%p1044_p13)
}
  0x3a   : > { %s1048_s11 = scalar_lea.vmem %s143_s4, 2048  ;;  %p1056_p1 = scmp.lt.s32.totalorder %s143_s4, %s143_s4 }
  0x3b   : > { %p1049_p7 = scmp.ne.s32.totalorder %s143_s4, %s1048_s11  ;;  %p1057_p4 = scmp.lt.s32.totalorder %s1048_s11, %s1048_s11 }
  0x3d   : > { %p1051_p9 = pnand %p1049_p7, %p1009_p8  ;;  %p1058_p0 = por %p1057_p4, %p1056_p1 }
  0x3f   : > { %p1052_p10 = pneg %p1051_p9 }
  0x41   : > { %p1059_p3 = pnand %p1058_p0, %p1052_p10 }
  0x43   : > { %1062 = shalt.err (!%p1059_p3)
}
  0x44   : > { %954 = dma.hbm_to_vmem [thread:$0]  (!%p1265_p2), %s1480_s1, 2048, %s143_s4, [#allocation6], %s1171_s19, %s1171_s19, %s1172_s20  }
  0x45   : > { %s156_s30 = sand.u32 1, %s1167_s15   ;;  %s158_s6 = sand.u32 1, %s1163_s14  }
  0x46   : > { %s681_s7 = sshll.u32 %s158_s6, 7  ;;  %s694_s8 = sshll.u32 %s1167_s15, 11 }
  0x47   : > { %s1333_s29 = scalar_lea.hbm %s1481_s2, %s694_s8  ;;  %s160_s28 = scalar_lea.vmem [#allocation7], %s681_s7 }
  0x48   : > { %s167_s22 = sshll.u32 %s160_s28, 4  ;;  %s1337_s11 = scalar_lea.sflag [#allocation3], %s156_s30  ;;  %s1335_s22 = int_to_ptr.vmem [resolvable:$true] %s167_s22 }
  0x49   : > { %s1063_s4 = scalar_lea.hbm %s1333_s29, 2048  ;;  %p1497_p8 = scmp.ne.s32.totalorder %s1496_s5, 0 }
  0x4a   : > { %p1064_p2 = scmp.ne.s32.totalorder %s1333_s29, %s1063_s4  ;;  %s1068_s6 = scalar_lea.hbm %s1481_s2, 4096 }
  0x4b   : > { %p1065_p3 = pneg %p1497_p8  ;;  %p1069_p11 = scmp.lt.u32.totalorder %s1333_s29, %s1481_s2 }
  0x4c   : > { %p1070_p12 = scmp.lt.u32.totalorder %s1068_s6, %s1063_s4  ;;  %p1072_p7 = scmp.lt.u32.totalorder %s1063_s4, %s1333_s29 }
  0x4d   : > { %p1066_p5 = pnand %p1065_p3, %p1064_p2 }
  0x4e   : > { %p1071_p13 = por %p1070_p12, %p1069_p11 }
  0x4f   : > { %p1067_p6 = pneg %p1066_p5 }
  0x50   : > { %p1073_p9 = por %p1072_p7, %p1071_p13 }
  0x52   : > { %p1074_p10 = pnand %p1073_p9, %p1067_p6 }
  0x54   : > { %1077 = shalt.err (!%p1074_p10)
}
  0x55   : > { %s1078_s30 = scalar_lea.vmem %s1335_s22, 2048  ;;  %s1173_s7 = smov [#allocation7]  }
  0x56   : > { %p1079_p1 = scmp.ne.s32.totalorder %s1335_s22, %s1078_s30  ;;  %s1083_s10 = sshll.u32 %s1173_s7, 4  ;;  %s1084_s10 = int_to_ptr.vmem [resolvable:$false] %s1083_s10 }
  0x57   : > { %s1085_s28 = scalar_lea.vmem %s1084_s10, 4096  ;;  %p1086_p2 = scmp.lt.s32.totalorder %s1335_s22, %s1084_s10 }
  0x58   : > { %p1081_p4 = pnand %p1079_p1, %p1065_p3  ;;  %p1087_p5 = scmp.lt.s32.totalorder %s1085_s28, %s1078_s30 }
  0x5a   : > { %p1082_p0 = pneg %p1081_p4  ;;  %p1088_p11 = por %p1087_p5, %p1086_p2 }
  0x5c   : > { %p1089_p12 = pnand %p1088_p11, %p1082_p0 }
  0x5e   : > { %1092 = shalt.err (!%p1089_p12)
}
  0x5f   : > { %958 = dma.hbm_to_vmem [thread:$0]  (!%p1497_p8), %s1333_s29, 2048, %s1335_s22, %s1337_s11, %s1171_s19, %s1171_s19, %s1172_s20  }
  0x60   : > { %p1498_p3 = scmp.ne.s32.totalorder %s1492_s26, 0 }
  0x61   : > { %p1499_p6 = scmp.eq.s32.totalorder (!%p1498_p3), %s1218_s16, 0 }
  0x62   : > { %179 = sbr.rel (%p1498_p3) target bundleno = 619 (0x26b), region = 32 }
  0x69   : > { %1138 = dma.done.wait (%p1499_p6), [#allocation3], 2048   ;;  %p1500_p13 = pmov %p1499_p6 }
  0x6a   : > { %p1501_p7 = pmov %p1499_p6 }
  0x6b   : > { %1140 = vsyncadd (%p1500_p13), [#allocation3], 4294965248 }
  0x6c   : > { %1142 = dma.done.wait (%p1501_p7), [#allocation6], 2048   ;;  %p1502_p9 = pmov %p1499_p6 }
  0x6d   : > { %s189_s19 = sand.u32 1, %s1218_s16   ;;  %s191_s20 = sand.u32 1, %s1159_s13  }
  0x6e   : > { %1144 = vsyncadd (%p1502_p9), [#allocation6], 4294965248  ;;  %s1382_s26 = sshll.u32 %s191_s20, 7  ;;  %s190_s5 = scalar_lea.sflag [#allocation3], %s189_s19 }
  0x6f   : > { %s1385_s29 = scalar_lea.vmem [#allocation7], %s1382_s26  ;;  %p1503_p8 = scmp.ne.s32.totalorder %s1489_s23, 0 }
  0x71   : > { %1146 = dma.done.wait (%p1503_p8), %s190_s5, 2048  }
  0x72   : > { %1148 = vsyncadd (%p1503_p8), %s190_s5, 4294965248  ;;  %v232_v0 = vld [vmem:[%s1385_s29] sm:$0xff]  ;;  %v233_v1 = vld [vmem:[%s1385_s29 + $0x8] sm:$0xff]  ;;  %s1408_s23 = scalar_lea.vmem [#allocation8], %s1382_s26  ;;  %s695_s22 = sshll.u32 %s1218_s16, 11 }
  0x73   : > { %v234_v2 = vld [vmem:[%s1385_s29 + $0x10] sm:$0xff]  ;;  %v872_v3 = vpack.c.bf16 %v233_v1, %v232_v0  ;;  %v235_v4 = vld [vmem:[%s1385_s29 + $0x18] sm:$0xff]  ;;  %v236_v6 = vld [vmem:[%s1385_s29 + $0x20] sm:$0xff]  ;;  %s584_s11 = sshll.u32 %s1408_s23, 4  ;;  %s1429_s27 = scalar_lea.hbm %s1482_s3, %s695_s22  ;;  %s1431_s11 = int_to_ptr.vmem [resolvable:$true] %s584_s11 }
  0x74   : > { %v876_v5 = vpack.c.bf16 %v235_v4, %v234_v2  ;;  %v237_v7 = vld [vmem:[%s1385_s29 + $0x28] sm:$0xff]  ;;  %v216_v9 = vld [vmem:[#allocation2] sm:$0xff]  ;;  %v238_v10 = vld [vmem:[%s1385_s29 + $0x30] sm:$0xff]  ;;  %s1437_s16 = scalar_lea.sflag [#allocation4], %s191_s20  ;;  %s1093_s6 = scalar_lea.vmem %s1431_s11, 2048 }
  0x75   : > { %873 = vmatprep.subr.bf16.mxu0 %v872_v3  ;;  %v880_v8 = vpack.c.bf16 %v237_v7, %v236_v6  ;;  %v239_v11 = vld [vmem:[%s1385_s29 + $0x38] sm:$0xff]  ;;  %792 = vmatprep.mubr.f32.mxu0 %v216_v9  ;;  %v240_v13 = vld [vmem:[%s1385_s29 + $0x40] sm:$0xff]  ;;  %v241_v14 = vld [vmem:[%s1385_s29 + $0x48] sm:$0xff]  ;;  %p1094_p10 = scmp.ne.s32.totalorder %s1431_s11, %s1093_s6  ;;  %p1504_p1 = scmp.ne.s32.totalorder %s1490_s24, 0 }
  0x76   : > { %875 = vmatpush3.bf16.msra.mxu0 %v872_v3  ;;  %v884_v12 = vpack.c.bf16 %v239_v11, %v238_v10  ;;  %v393_v15 = vld [vmem:[#allocation5] sm:$0xff]  ;;  %v394_v16 = vld [vmem:[#allocation5 + $0x8] sm:$0xff]  ;;  %v395_v17 = vld [vmem:[#allocation5 + $0x10] sm:$0xff]  ;;  %v888_v21 = vpack.c.bf16 %v241_v14, %v240_v13  ;;  %s1174_s8 = smov [#allocation8]  }
  0x77   : > { %877 = vmatprep.subr.bf16.mxu0 %v876_v5  ;;  %v396_v18 = vld [vmem:[#allocation5 + $0x18] sm:$0xff]  ;;  %v904_v19 = vpack.c.bf16 %v394_v16, %v393_v15  ;;  %v397_v22 = vld [vmem:[#allocation5 + $0x20] sm:$0xff]  ;;  %v398_v23 = vld [vmem:[#allocation5 + $0x28] sm:$0xff]  ;;  %p1095_p4 = pnand %p1094_p10, %p1504_p1  ;;  %s1097_s9 = sshll.u32 %s1174_s8, 4  ;;  %s1098_s9 = int_to_ptr.vmem [resolvable:$false] %s1097_s9 }
  0x78   : > { %v908_v20 = vpack.c.bf16 %v396_v18, %v395_v17  ;;  %v242_v24 = vld [vmem:[%s1385_s29 + $0x50] sm:$0xff]  ;;  %v243_v25 = vld [vmem:[%s1385_s29 + $0x58] sm:$0xff]  ;;  %v912_v26 = vpack.c.bf16 %v398_v23, %v397_v22  ;;  %v244_v30 = vld [vmem:[%s1385_s29 + $0x60] sm:$0xff]  ;;  %s1099_s30 = scalar_lea.vmem %s1098_s9, 4096  ;;  %p1100_p2 = scmp.lt.s32.totalorder %s1431_s11, %s1098_s9 }
  0x79   : > { %905 = vmatprep.subr.bf16.mxu1 %v904_v19  ;;  %v892_v27 = vpack.c.bf16 %v243_v25, %v242_v24  ;;  %v399_v28 = vld [vmem:[#allocation5 + $0x30] sm:$0xff]  ;;  %v400_v29 = vld [vmem:[#allocation5 + $0x38] sm:$0xff]  ;;  %v245_v31 = vld [vmem:[%s1385_s29 + $0x68] sm:$0xff]  ;;  %p1096_p0 = pneg %p1095_p4  ;;  %p1101_p5 = scmp.lt.s32.totalorder %s1099_s30, %s1093_s6 }
  0x7a   : > { %879 = vmatpush3.bf16.msra.mxu0 %v876_v5  ;;  %907 = vmatpush3.bf16.msra.mxu1 %v904_v19  ;;  %v916_v32 = vpack.c.bf16 %v400_v29, %v399_v28  ;;  %v896_v33 = vpack.c.bf16 %v245_v31, %v244_v30  ;;  %v401_v34 = vld [vmem:[#allocation5 + $0x40] sm:$0xff]  ;;  %v402_v35 = vld [vmem:[#allocation5 + $0x48] sm:$0xff]  ;;  %v246_v36 = vld [vmem:[%s1385_s29 + $0x70] sm:$0xff] }
  0x7b   : > { %881 = vmatprep.subr.bf16.mxu0 %v880_v8  ;;  %909 = vmatprep.subr.bf16.mxu1 %v908_v20  ;;  %v247_v37 = vld [vmem:[%s1385_s29 + $0x78] sm:$0xff]  ;;  %v920_v38 = vpack.c.bf16 %v402_v35, %v401_v34  ;;  %v403_v40 = vld [vmem:[#allocation5 + $0x50] sm:$0xff]  ;;  %v405_v43 = vld [vmem:[#allocation5 + $0x60] sm:$0xff]  ;;  %p1102_p11 = por %p1101_p5, %p1100_p2 }
  0x7c   : > { %v900_v39 = vpack.c.bf16 %v247_v37, %v246_v36  ;;  %v404_v41 = vld [vmem:[#allocation5 + $0x58] sm:$0xff]  ;;  %v406_v44 = vld [vmem:[#allocation5 + $0x68] sm:$0xff]  ;;  %v218_v47 = vld [vmem:[#allocation2 + $0x10] sm:$0xff] }
  0x7d   : > { %v924_v42 = vpack.c.bf16 %v404_v41, %v403_v40  ;;  %v217_v45 = vld [vmem:[#allocation2 + $0x8] sm:$0xff]  ;;  %v928_v46 = vpack.c.bf16 %v406_v44, %v405_v43  ;;  %v407_v48 = vld [vmem:[#allocation5 + $0x70] sm:$0xff]  ;;  %v408_v49 = vld [vmem:[#allocation5 + $0x78] sm:$0xff]  ;;  %p1103_p12 = pnand %p1102_p11, %p1096_p0 }
  0x7e   : > { %883 = vmatpush3.bf16.msra.mxu0 %v880_v8  ;;  %911 = vmatpush3.bf16.msra.mxu1 %v908_v20  ;;  %v219_v50 = vld [vmem:[#allocation2 + $0x18] sm:$0xff]  ;;  %v932_v51 = vpack.c.bf16 %v408_v49, %v407_v48  ;;  %v220_v52 = vld [vmem:[#allocation2 + $0x20] sm:$0xff]  ;;  %v221_v53 = vld [vmem:[#allocation2 + $0x28] sm:$0xff] }
  0x7f   : > { %885 = vmatprep.subr.bf16.mxu0 %v884_v12  ;;  %913 = vmatprep.subr.bf16.mxu1 %v912_v26  ;;  %v222_v54 = vld [vmem:[#allocation2 + $0x30] sm:$0xff]  ;;  %v223_v55 = vld [vmem:[#allocation2 + $0x38] sm:$0xff]  ;;  %v224_v56 = vld [vmem:[#allocation2 + $0x40] sm:$0xff] }
  0x80   : > { %v225_v57 = vld [vmem:[#allocation2 + $0x48] sm:$0xff]  ;;  %v226_v58 = vld [vmem:[#allocation2 + $0x50] sm:$0xff]  ;;  %v227_v59 = vld [vmem:[#allocation2 + $0x58] sm:$0xff] }
  0x81   : > { %v228_v60 = vld [vmem:[#allocation2 + $0x60] sm:$0xff]  ;;  %v229_v61 = vld [vmem:[#allocation2 + $0x68] sm:$0xff]  ;;  %v230_v62 = vld [vmem:[#allocation2 + $0x70] sm:$0xff] }
  0x82   : > { %887 = vmatpush3.bf16.msra.mxu0 %v884_v12  ;;  %915 = vmatpush3.bf16.msra.mxu1 %v912_v26  ;;  %v231_v63 = vld [vmem:[#allocation2 + $0x78] sm:$0xff] }
  0x83   : > { %889 = vmatprep.subr.bf16.mxu0 %v888_v21  ;;  %917 = vmatprep.subr.bf16.mxu1 %v916_v32 }
  0x86   : > { %891 = vmatpush3.bf16.msra.mxu0 %v888_v21  ;;  %919 = vmatpush3.bf16.msra.mxu1 %v916_v32 }
  0x87   : > { %893 = vmatprep.subr.bf16.mxu0 %v892_v27  ;;  %921 = vmatprep.subr.bf16.mxu1 %v920_v38 }
  0x8a   : > { %895 = vmatpush3.bf16.msra.mxu0 %v892_v27  ;;  %923 = vmatpush3.bf16.msra.mxu1 %v920_v38 }
  0x8b   : > { %897 = vmatprep.subr.bf16.mxu0 %v896_v33  ;;  %925 = vmatprep.subr.bf16.mxu1 %v924_v42 }
  0x8e   : > { %899 = vmatpush3.bf16.msra.mxu0 %v896_v33  ;;  %927 = vmatpush3.bf16.msra.mxu1 %v924_v42 }
  0x8f   : > { %901 = vmatprep.subr.bf16.mxu0 %v900_v39  ;;  %929 = vmatprep.subr.bf16.mxu1 %v928_v46 }
  0x92   : > { %903 = vmatpush3.bf16.msra.mxu0 %v900_v39  ;;  %931 = vmatpush3.bf16.msra.mxu1 %v928_v46 }
  0x93   : > { %933 = vmatprep.subr.bf16.mxu1 %v932_v51 }
  0x95   : > { %793 = vmatmul.mubr.f32.vlgmr.msra.gmra.mrb[0].mxu0 %v217_v45 }
  0x96   : > { %795 = vmatprep.mubr.f32.mxu0 %v218_v47  ;;  %935 = vmatpush3.bf16.msra.mxu1 %v932_v51 }
  0x99   : > { %796 = vmatmul.mubr.f32.gmra.mrb[2].mxu0 %v219_v50 }
  0x9a   : > { %798 = vmatprep.mubr.f32.mxu0 %v220_v52 }
  0x9d   : > { %799 = vmatmul.mubr.f32.gmra.mrb[4].mxu0 %v221_v53 }
  0x9e   : > { %801 = vmatprep.mubr.f32.mxu0 %v222_v54 }
  0xa1   : > { %802 = vmatmul.mubr.f32.gmra.mrb[6].mxu0 %v223_v55 }
  0xa2   : > { %804 = vmatprep.mubr.f32.mxu0 %v224_v56 }
  0xa5   : > { %805 = vmatmul.mubr.f32.gmra.mrb[8].mxu0 %v225_v57 }
  0xa6   : > { %807 = vmatprep.mubr.f32.mxu0 %v226_v58 }
  0xa9   : > { %808 = vmatmul.mubr.f32.gmra.mrb[10].mxu0 %v227_v59 }
  0xaa   : > { %810 = vmatprep.mubr.f32.mxu0 %v228_v60 }
  0xad   : > { %811 = vmatmul.mubr.f32.gmra.mrb[12].mxu0 %v229_v61 }
  0xae   : > { %813 = vmatprep.mubr.f32.mxu0 %v230_v62 }
  0xb1   : > { %814 = vmatmul.mubr.f32.gmra.mrb[14].mxu0 %v231_v63 }
 0x168   : > { %v794_v0 = vpop.f32.mrb[0].mxu0 }
 0x169   : > { %v314_v1 = vpop.f32.mrb[1].mxu0 }
 0x16a   : > { %848 = vmatprep.mubr.f32.mxu1 %v314_v1 }
 0x16b   : > { %849 = vmatmul.mubr.f32.vlgmr.msra.gmra.mrb[0].mxu1 %v794_v0 }
 0x16c   : > { %v797_v2 = vpop.f32.mrb[2].mxu0 }
 0x16d   : > { %v324_v3 = vpop.f32.mrb[3].mxu0 }
 0x16e   : > { %851 = vmatprep.mubr.f32.mxu1 %v324_v3 }
 0x16f   : > { %852 = vmatmul.mubr.f32.gmra.mrb[2].mxu1 %v797_v2 }
 0x170   : > { %v800_v4 = vpop.f32.mrb[4].mxu0 }
 0x171   : > { %v334_v5 = vpop.f32.mrb[5].mxu0 }
 0x172   : > { %854 = vmatprep.mubr.f32.mxu1 %v334_v5 }
 0x173   : > { %855 = vmatmul.mubr.f32.gmra.mrb[4].mxu1 %v800_v4 }
 0x174   : > { %v803_v6 = vpop.f32.mrb[6].mxu0 }
 0x175   : > { %v344_v7 = vpop.f32.mrb[7].mxu0 }
 0x176   : > { %857 = vmatprep.mubr.f32.mxu1 %v344_v7 }
 0x177   : > { %858 = vmatmul.mubr.f32.gmra.mrb[6].mxu1 %v803_v6 }
 0x178   : > { %v806_v8 = vpop.f32.mrb[8].mxu0 }
 0x179   : > { %v354_v9 = vpop.f32.mrb[9].mxu0 }
 0x17a   : > { %860 = vmatprep.mubr.f32.mxu1 %v354_v9 }
 0x17b   : > { %861 = vmatmul.mubr.f32.gmra.mrb[8].mxu1 %v806_v8 }
 0x17c   : > { %v809_v10 = vpop.f32.mrb[10].mxu0 }
 0x17d   : > { %v364_v11 = vpop.f32.mrb[11].mxu0 }
 0x17e   : > { %863 = vmatprep.mubr.f32.mxu1 %v364_v11 }
 0x17f   : > { %864 = vmatmul.mubr.f32.gmra.mrb[10].mxu1 %v809_v10 }
 0x180   : > { %v812_v12 = vpop.f32.mrb[12].mxu0 }
 0x181   : > { %v374_v13 = vpop.f32.mrb[13].mxu0 }
 0x182   : > { %866 = vmatprep.mubr.f32.mxu1 %v374_v13 }
 0x183   : > { %867 = vmatmul.mubr.f32.gmra.mrb[12].mxu1 %v812_v12 }
 0x184   : > { %v815_v14 = vpop.f32.mrb[14].mxu0 }
 0x185   : > { %v384_v15 = vpop.f32.mrb[15].mxu0 }
 0x186   : > { %869 = vmatprep.mubr.f32.mxu1 %v384_v15 }
 0x187   : > { %870 = vmatmul.mubr.f32.gmra.mrb[14].mxu1 %v815_v14 }
 0x23e   : > { %v850_v16 = vpop.f32.mrb[0].mxu1 }
 0x23f   : > { %555 = vst [vmem:[%s1408_s23 + $0x8] sm:$0xff] %v850_v16  ;;  %v475_v17 = vpop.f32.mrb[1].mxu1 }
 0x240   : > { %554 = vst [vmem:[%s1408_s23] sm:$0xff] %v475_v17 }
 0x242   : > { %v853_v18 = vpop.f32.mrb[2].mxu1 }
 0x243   : > { %557 = vst [vmem:[%s1408_s23 + $0x18] sm:$0xff] %v853_v18  ;;  %v485_v19 = vpop.f32.mrb[3].mxu1 }
 0x244   : > { %556 = vst [vmem:[%s1408_s23 + $0x10] sm:$0xff] %v485_v19 }
 0x246   : > { %v856_v20 = vpop.f32.mrb[4].mxu1 }
 0x247   : > { %559 = vst [vmem:[%s1408_s23 + $0x28] sm:$0xff] %v856_v20  ;;  %v495_v21 = vpop.f32.mrb[5].mxu1 }
 0x248   : > { %558 = vst [vmem:[%s1408_s23 + $0x20] sm:$0xff] %v495_v21 }
 0x24a   : > { %v859_v22 = vpop.f32.mrb[6].mxu1 }
 0x24b   : > { %561 = vst [vmem:[%s1408_s23 + $0x38] sm:$0xff] %v859_v22  ;;  %v505_v23 = vpop.f32.mrb[7].mxu1 }
 0x24c   : > { %560 = vst [vmem:[%s1408_s23 + $0x30] sm:$0xff] %v505_v23 }
 0x24e   : > { %v862_v24 = vpop.f32.mrb[8].mxu1 }
 0x24f   : > { %563 = vst [vmem:[%s1408_s23 + $0x48] sm:$0xff] %v862_v24  ;;  %v515_v25 = vpop.f32.mrb[9].mxu1 }
 0x250   : > { %562 = vst [vmem:[%s1408_s23 + $0x40] sm:$0xff] %v515_v25 }
 0x252   : > { %v865_v26 = vpop.f32.mrb[10].mxu1 }
 0x253   : > { %565 = vst [vmem:[%s1408_s23 + $0x58] sm:$0xff] %v865_v26  ;;  %v525_v27 = vpop.f32.mrb[11].mxu1 }
 0x254   : > { %564 = vst [vmem:[%s1408_s23 + $0x50] sm:$0xff] %v525_v27 }
 0x256   : > { %v868_v28 = vpop.f32.mrb[12].mxu1 }
 0x257   : > { %567 = vst [vmem:[%s1408_s23 + $0x68] sm:$0xff] %v868_v28  ;;  %v535_v29 = vpop.f32.mrb[13].mxu1 }
 0x258   : > { %566 = vst [vmem:[%s1408_s23 + $0x60] sm:$0xff] %v535_v29 }
 0x25a   : > { %v871_v30 = vpop.f32.mrb[14].mxu1 }
 0x25b   : > { %569 = vst [vmem:[%s1408_s23 + $0x78] sm:$0xff] %v871_v30  ;;  %v545_v31 = vpop.f32.mrb[15].mxu1 }
 0x25c   : > { %568 = vst [vmem:[%s1408_s23 + $0x70] sm:$0xff] %v545_v31 }
 0x25d   : > { %1106 = shalt.err (!%p1103_p12)
}
 0x25e   : > { %s1107_s7 = scalar_lea.hbm %s1429_s27, 2048  ;;  %s1111_s19 = scalar_lea.hbm %s1482_s3, 4096 }
 0x25f   : > { %p1108_p3 = scmp.ne.s32.totalorder %s1429_s27, %s1107_s7  ;;  %p1112_p7 = scmp.lt.u32.totalorder %s1429_s27, %s1482_s3 }
 0x260   : > { %p1113_p9 = scmp.lt.u32.totalorder %s1111_s19, %s1107_s7  ;;  %p1115_p10 = scmp.lt.u32.totalorder %s1107_s7, %s1429_s27 }
 0x261   : > { %p1109_p6 = pnand %p1108_p3, %p1504_p1 }
 0x262   : > { %p1114_p8 = por %p1113_p9, %p1112_p7 }
 0x263   : > { %p1110_p13 = pneg %p1109_p6 }
 0x264   : > { %p1116_p4 = por %p1115_p10, %p1114_p8 }
 0x266   : > { %p1117_p0 = pnand %p1116_p4, %p1110_p13 }
 0x268   : > { %1120 = shalt.err (!%p1117_p0)
}
 0x269   : > { %s1175_s5 = smov 128   ;;  %s1176_s29 = smov 8  }
 0x26a   : > { %946 = dma.vmem_to_hbm [thread:$0]  (%p1504_p1), %s1431_s11, 2048, %s1429_s27, %s1437_s16, %s1175_s5, %s1175_s5, %s1176_s29  }
 0x26b PF: > { %s599_s23 = sand.u32 1, %s1155_s12   ;;  %p1505_p2 = scmp.ne.s32.totalorder %s1491_s25, 0 }
 0x26c   : > { %p1506_p5 = scmp.ge.s32.totalorder %s1167_s15, 2  ;;  %s600_s22 = scalar_lea.sflag [#allocation4], %s599_s23 }
 0x26e   : > { %p960_p11 = pnand %p1506_p5, %p1505_p2 }
 0x270   : > { %1150 = dma.done.wait (!%p960_p11), %s600_s22, 2048  }
 0x271   : > { %1152 = vsyncadd (!%p960_p11), %s600_s22, 4294965248  ;;  %p15_p12 = scmp.ge.s32.totalorder %s1222_s18, 4   ;;  %s1507_s12 = smov %s1159_s13 }
 0x272   : > { %s1508_s13 = smov %s1163_s14  ;;  %s1509_s14 = smov %s1234_s21 }
 0x273   : > { %s1510_s15 = smov %s1222_s18  ;;  %17 = sbr.rel (!%p15_p12) target bundleno = 5 (0x5), region = 84 }
 0x27a   :  { %605 = vsyncpa [#allocation3], 1 }
 0x27b   :  { %607 = vsyncpa [#allocation3 + $0x1], 1 }
 0x27c   :  { %608 = vsyncpa [#allocation6], 1 }
 0x27d   :  { %609 = vsyncpa [#allocation4], 1 }
 0x27e   :  { %611 = vsyncpa [#allocation4 + $0x1], 1 }

</bundles_post_ra>
